<compile_context>
chip_gen: v7x
topology: tpu7x:2x2x1
jax: 0.10.0
libtpu: 0.0.40
codegen_flags: <defaults>
</compile_context>

<pallas_src>
import functools

import jax
import jax.numpy as jnp
from jax import lax
from jax.experimental import pallas as pl
from jax.experimental.pallas import tpu as pltpu

LANES = 128      # lane width; also the zero-padded class dimension
SUBLANES = 8     # f32 sublane tile


def _vat_kernel(x_ref, dlt_ref, w_ref, gram_ref, t_ref, b_ref, out_ref,
                acc_xw, acc_dw, acc_dsq,
                *, num_classes, n_valid, radius):
    """Grid = (N_pad // TM, D_pad // TK).

    Axis 0 ("parallel"): row tiles (sharded across TensorCores on v7x).
    Axis 1 ("arbitrary"): reduction over the feature dim with VMEM accumulators,
    init at k == 0 and finalize at k == last (pl.when).
    """
    tm, c_pad = acc_xw.shape
    k = pl.program_id(1)
    # NOTE: program_id must be read at top level (not inside a pl.when body) —
    # the interpret/CPU fallback cannot substitute it inside cond sub-jaxprs.
    row_base = pl.program_id(0) * tm

    # ---- init accumulators at the start of every D sweep --------------------
    @pl.when(k == 0)
    def _():
        acc_xw[...] = jnp.zeros_like(acc_xw)
        acc_dw[...] = jnp.zeros_like(acc_dw)
        acc_dsq[...] = jnp.zeros_like(acc_dsq)

    # ---- streaming accumulation over the feature (D) axis -------------------
    x_t = x_ref[...]                           # (tm, tk)    f32
    d_t = dlt_ref[...].astype(jnp.float32)     # (tm, tk)    bf16 -> f32
    w_t = w_ref[...]                           # (tk, c_pad) f32

    acc_xw[...] += jnp.dot(x_t, w_t, preferred_element_type=jnp.float32)
    acc_dw[...] += jnp.dot(d_t, w_t, preferred_element_type=jnp.float32)

    # ||delta||^2 as per-lane partials (static lane-aligned slices, no reshape):
    # avoids a cross-lane XLU reduce on every k step; one reduce in the finalize.
    tk = x_t.shape[1]
    d2_part = jnp.zeros((tm, c_pad), jnp.float32)
    for j in range(tk // LANES):
        blk = d_t[:, j * LANES:(j + 1) * LANES]
        d2_part = d2_part + blk * blk
    acc_dsq[...] += d2_part

    # ---- finalize: all (tm, c_pad) math stays VMEM-resident ------------------
    @pl.when(k == pl.num_programs(1) - 1)
    def _():
        b_v = b_ref[...]                       # (1, c_pad)   f32
        t = t_ref[...]                         # (tm, c_pad)  target logits
        gram = gram_ref[...]                   # (c_pad, c_pad) = W^T W (hoisted)
        xw = acc_xw[...]
        dw = acc_dw[...]
        dsq = jnp.sum(acc_dsq[...], axis=-1, keepdims=True)   # single XLU reduce

        col = lax.broadcasted_iota(jnp.int32, (1, c_pad), 1)
        cmask = col < num_classes              # mask padded classes
        neg = jnp.float32(-1e30)

        def masked_softmax_and_log(z):
            zm = jnp.where(cmask, z, neg)
            m = jnp.max(zm, axis=-1, keepdims=True)
            e = jnp.exp(zm - m)                # padded lanes -> exactly 0
            s = jnp.sum(e, axis=-1, keepdims=True)
            return e / s, zm - (m + jnp.log(s))

        # Matches normalize_perturbation: divisor = sqrt(max(sum(d^2), 1e-12)).
        inv_dn = lax.rsqrt(jnp.maximum(dsq, 1e-12))
        z1 = xw + b_v + (1e-6 * inv_dn) * dw
        q1, _ = masked_softmax_and_log(z1)
        p_t, logp_t = masked_softmax_and_log(t)   # softmax(logits): computed once

        # Analytic d(KL)/d(delta) = g @ W^T, handled via the Gram matrix.
        g = (q1 - p_t) * jnp.float32(1.0 / n_valid)                  # (tm, c_pad)
        gG = jnp.dot(g, gram, preferred_element_type=jnp.float32)    # = grad @ W
        gsq = jnp.sum(g * gG, axis=-1, keepdims=True)                # = ||grad||^2
        inv_gn = lax.rsqrt(jnp.maximum(gsq, 1e-12))
        z2 = xw + b_v + (radius * inv_gn) * gG   # = (x + radius*normalize(grad)) @ W + b

        _, logq2 = masked_softmax_and_log(z2)
        kl = jnp.where(cmask, p_t * (logp_t - logq2), 0.0)
        kl_row = jnp.sum(kl, axis=-1, keepdims=True)   # (tm, 1) per-row KL

        # Zero rows that are pure batch padding, then store lane-dense
        # (every lane of row i holds that row's KL; host does a dense sum).
        row = lax.broadcasted_iota(jnp.int32, (tm, 1), 0) + row_base
        kl_row = jnp.where(row < n_valid, kl_row, 0.0)
        out_ref[...] = jnp.broadcast_to(kl_row, out_ref.shape).astype(out_ref.dtype)


def _round_up(v, m):
    return ((v + m - 1) // m) * m


def virtual_adversarial_loss(x, logits, w, b, key, radius=1.0):
    """VAT forward for the synthetic linear model, fused into one pallas_call."""
    n = x.shape[0]
    num_classes = w.shape[1]
    assert num_classes <= LANES, "class dimension must fit one lane tile"
    x_flat = x.reshape(n, -1).astype(jnp.float32)
    d = x_flat.shape[1]

    # delta = randn_like(x); L2 normalization and the 1e-6 scaling happen in-kernel.
    # TODO(synk): delta could be generated on-chip (pltpu.prng_seed + prng_random_bits)
    # to drop this HBM stream entirely; kept as an input so numerics follow jax.random.
    delta = jax.random.normal(key, x_flat.shape, dtype=jnp.float32)

    # Row tile: big enough to fill the MXU and amortize W re-reads, but capped so
    # the "parallel" row axis keeps >= 2 tiles (both v7x TensorCores busy) when the
    # batch allows.
    n8 = _round_up(n, SUBLANES)
    if n8 >= 2 * SUBLANES:
        tm = min(256, _round_up(n8 // 2, SUBLANES))
    else:
        tm = n8
    n_pad = _round_up(n8, tm)

    # K tile: always large; zero-padding D up to a 512 multiple is cheaper than
    # degrading to 128/256-wide tiles (3-4x more grid steps, smaller DMAs).
    if d <= 512:
        tk = _round_up(d, LANES)       # single reduction step for small D
    else:
        tk = 512
    d_pad = _round_up(d, tk)
    # Per-step VMEM (tm=256, tk=512, double-buffered): ~3 MiB — fine on v5e/v6e/v7x.

    def pad2(a, rows, cols):
        return jnp.pad(a, ((0, rows - a.shape[0]), (0, cols - a.shape[1])))

    # x and W stay f32 so the 1e-6 perturbation stays above quantization noise of
    # the externally supplied f32 logits; delta (a random direction) is bf16.
    x_p = pad2(x_flat, n_pad, d_pad)
    dlt_p = pad2(delta, n_pad, d_pad).astype(jnp.bfloat16)
    w_p = pad2(w.astype(jnp.float32), d_pad, LANES)
    t_p = pad2(logits.astype(jnp.float32), n_pad, LANES)
    b_p = pad2(b.astype(jnp.float32).reshape(1, -1), 1, LANES)

    # Gram = W^T W hoisted out of the kernel: one tiny (128,128) matmul here
    # instead of a redundant (tk,128)x(tk,128) matmul on every grid step.
    gram = jnp.dot(w_p.T, w_p, preferred_element_type=jnp.float32,
                   precision=lax.Precision.HIGHEST)

    grid = (n_pad // tm, d_pad // tk)

    kern = functools.partial(
        _vat_kernel, num_classes=num_classes, n_valid=n, radius=float(radius))

    per_row = pl.pallas_call(
        kern,
        out_shape=jax.ShapeDtypeStruct((n_pad, LANES), jnp.float32),
        grid_spec=pltpu.PrefetchScalarGridSpec(
            num_scalar_prefetch=0,
            grid=grid,
            in_specs=[
                pl.BlockSpec((tm, tk), lambda i, k: (i, k)),         # x
                pl.BlockSpec((tm, tk), lambda i, k: (i, k)),         # delta
                pl.BlockSpec((tk, LANES), lambda i, k: (k, 0)),      # W (classes padded)
                pl.BlockSpec((LANES, LANES), lambda i, k: (0, 0)),   # Gram (hoisted)
                pl.BlockSpec((tm, LANES), lambda i, k: (i, 0)),      # target logits
                pl.BlockSpec((1, LANES), lambda i, k: (0, 0)),       # bias
            ],
            out_specs=pl.BlockSpec((tm, LANES), lambda i, k: (i, 0)),
            scratch_shapes=[
                pltpu.VMEM((tm, LANES), jnp.float32),    # acc x @ W
                pltpu.VMEM((tm, LANES), jnp.float32),    # acc delta @ W
                pltpu.VMEM((tm, LANES), jnp.float32),    # per-lane ||delta||^2 partials
            ]),
        compiler_params=pltpu.CompilerParams(
            dimension_semantics=("parallel", "arbitrary"),
            vmem_limit_bytes=32 * 1024 * 1024),
    )(x_p, dlt_p, w_p, gram, t_p, b_p)

    # per_row[i, :] holds row i's KL broadcast across all 128 lanes (padded rows
    # already zeroed in-kernel); dense, lane-friendly batchmean reduction:
    return jnp.sum(per_row) / (n * LANES)


if __name__ == "__main__":
    # Small deterministic shapes: batch=2, channels=4, spatial=16x16, 10 classes.
    N, C, H, W = 2, 4, 16, 16
    NUM_CLASSES = 10
    D = C * H * W

    key = jax.random.PRNGKey(0)
    k_x, k_w, k_delta = jax.random.split(key, 3)

    x = jax.random.normal(k_x, (N, C, H, W), dtype=jnp.float32)

    # TODO(synk): the torch module wraps an arbitrary nn.Module; here the model is
    # a fixed linear classifier so loss.backward() has a closed form in-kernel.
    w = 0.02 * jax.random.normal(k_w, (D, NUM_CLASSES), dtype=jnp.float32)
    b = jnp.zeros((NUM_CLASSES,), dtype=jnp.float32)
    # logits = model(x), as in typical VAT usage (keeps the KL target consistent
    # with the in-kernel forward so the 1e-6 perturbation is the actual signal).
    logits = x.reshape(N, -1) @ w + b

    loss = virtual_adversarial_loss(x, logits, w, b, k_delta, radius=1.0)
    loss = jax.block_until_ready(loss)
    assert loss.shape == () and bool(jnp.isfinite(loss))
    print("KERNEL_OK")
</pallas_src>

<mosaic_0001>
module attributes {stable_mosaic.version = 11 : i64} {
  func.func @_vat_kernel(%arg0: i32, %arg1: i32, %arg2: memref<8x512xf32, #tpu.memory_space<vmem>>, %arg3: memref<8x512xbf16, #tpu.memory_space<vmem>>, %arg4: memref<512x128xf32, #tpu.memory_space<vmem>>, %arg5: memref<128x128xf32, #tpu.memory_space<vmem>>, %arg6: memref<8x128xf32, #tpu.memory_space<vmem>>, %arg7: memref<1x128xf32, #tpu.memory_space<vmem>>, %arg8: memref<8x128xf32, #tpu.memory_space<vmem>>, %arg9: memref<8x128xf32, #tpu.memory_space<vmem>>, %arg10: memref<8x128xf32, #tpu.memory_space<vmem>>, %arg11: memref<8x128xf32, #tpu.memory_space<vmem>>) attributes {dimension_semantics = [#tpu.dimension_semantics<parallel>, #tpu.dimension_semantics<arbitrary>], iteration_bounds = array<i64: 1, 2>, scalar_prefetch = 0 : i64, scratch_operands = 3 : i64, tpu.core_type = #tpu.core_type<tc>, window_params = [{transform_indices = @transform_0, window_bounds = array<i64: 8, 512>}, {transform_indices = @transform_1, window_bounds = array<i64: 8, 512>}, {transform_indices = @transform_2, window_bounds = array<i64: 512, 128>}, {pipeline_mode = #tpu.pipeline_mode<synchronous>, transform_indices = @transform_3, window_bounds = array<i64: 128, 128>}, {transform_indices = @transform_4, window_bounds = array<i64: 8, 128>}, {pipeline_mode = #tpu.pipeline_mode<synchronous>, transform_indices = @transform_5, window_bounds = array<i64: 1, 128>}, {transform_indices = @transform_6, window_bounds = array<i64: 8, 128>}]} {
    %c8_i32 = arith.constant 8 : i32
    %0 = arith.muli %arg0, %c8_i32 : i32
    %c0_i32 = arith.constant 0 : i32
    %1 = arith.cmpi eq, %arg1, %c0_i32 : i32
    %2 = arith.extui %1 : i1 to i32
    %c0_i32_0 = arith.constant 0 : i32
    %3 = arith.cmpi ne, %2, %c0_i32_0 : i32
    scf.if %3 {
      %cst_21 = arith.constant 0.000000e+00 : f32
      %35 = vector.broadcast %cst_21 : f32 to vector<8x128xf32>
      %c0_22 = arith.constant 0 : index
      %c0_23 = arith.constant 0 : index
      %36 = vector.load %arg9[%c0_22, %c0_23] : memref<8x128xf32, #tpu.memory_space<vmem>>, vector<8x128xf32>
      tpu.vector_store %arg9[%c0_22, %c0_23], %35 {strides = array<i32>} : memref<8x128xf32, #tpu.memory_space<vmem>>, vector<8x128xf32>,
      %cst_24 = arith.constant 0.000000e+00 : f32
      %37 = vector.broadcast %cst_24 : f32 to vector<8x128xf32>
      %c0_25 = arith.constant 0 : index
      %c0_26 = arith.constant 0 : index
      %38 = vector.load %arg10[%c0_25, %c0_26] : memref<8x128xf32, #tpu.memory_space<vmem>>, vector<8x128xf32>
      tpu.vector_store %arg10[%c0_25, %c0_26], %37 {strides = array<i32>} : memref<8x128xf32, #tpu.memory_space<vmem>>, vector<8x128xf32>,
      %cst_27 = arith.constant 0.000000e+00 : f32
      %39 = vector.broadcast %cst_27 : f32 to vector<8x128xf32>
      %c0_28 = arith.constant 0 : index
      %c0_29 = arith.constant 0 : index
      %40 = vector.load %arg11[%c0_28, %c0_29] : memref<8x128xf32, #tpu.memory_space<vmem>>, vector<8x128xf32>
      tpu.vector_store %arg11[%c0_28, %c0_29], %39 {strides = array<i32>} : memref<8x128xf32, #tpu.memory_space<vmem>>, vector<8x128xf32>,
    } else {
    }
    %c0 = arith.constant 0 : index
    %c0_1 = arith.constant 0 : index
    %4 = vector.load %arg2[%c0, %c0_1] : memref<8x512xf32, #tpu.memory_space<vmem>>, vector<8x512xf32>
    %c0_2 = arith.constant 0 : index
    %c0_3 = arith.constant 0 : index
    %5 = vector.load %arg3[%c0_2, %c0_3] : memref<8x512xbf16, #tpu.memory_space<vmem>>, vector<8x512xbf16>
    %6 = arith.extf %5 : vector<8x512xbf16> to vector<8x512xf32>
    %c0_4 = arith.constant 0 : index
    %c0_5 = arith.constant 0 : index
    %7 = vector.load %arg4[%c0_4, %c0_5] : memref<512x128xf32, #tpu.memory_space<vmem>>, vector<512x128xf32>
    %c0_6 = arith.constant 0 : index
    %c0_7 = arith.constant 0 : index
    %8 = vector.load %arg9[%c0_6, %c0_7] : memref<8x128xf32, #tpu.memory_space<vmem>>, vector<8x128xf32>
    %cst = arith.constant dense<0.000000e+00> : vector<8x128xf32>
    %9 = tpu.matmul %4, %7, %cst {dimension_numbers = #tpu.dot_dimension_numbers<[1], [0], [0], [1], [0, 0, 1, 1], [], []>} : vector<8x512xf32>, vector<512x128xf32>, vector<8x128xf32> -> vector<8x128xf32>
    %10 = arith.addf %8, %9 : vector<8x128xf32>
    %c0_8 = arith.constant 0 : index
    %c0_9 = arith.constant 0 : index
    %11 = vector.load %arg9[%c0_8, %c0_9] : memref<8x128xf32, #tpu.memory_space<vmem>>, vector<8x128xf32>
    tpu.vector_store %arg9[%c0_8, %c0_9], %10 {strides = array<i32>} : memref<8x128xf32, #tpu.memory_space<vmem>>, vector<8x128xf32>,
    %c0_10 = arith.constant 0 : index
    %c0_11 = arith.constant 0 : index
    %12 = vector.load %arg10[%c0_10, %c0_11] : memref<8x128xf32, #tpu.memory_space<vmem>>, vector<8x128xf32>
    %cst_12 = arith.constant dense<0.000000e+00> : vector<8x128xf32>
    %13 = tpu.matmul %6, %7, %cst_12 {dimension_numbers = #tpu.dot_dimension_numbers<[1], [0], [0], [1], [0, 0, 1, 1], [], []>} : vector<8x512xf32>, vector<512x128xf32>, vector<8x128xf32> -> vector<8x128xf32>
    %14 = arith.addf %12, %13 : vector<8x128xf32>
    %c0_13 = arith.constant 0 : index
    %c0_14 = arith.constant 0 : index
    %15 = vector.load %arg10[%c0_13, %c0_14] : memref<8x128xf32, #tpu.memory_space<vmem>>, vector<8x128xf32>
    tpu.vector_store %arg10[%c0_13, %c0_14], %14 {strides = array<i32>} : memref<8x128xf32, #tpu.memory_space<vmem>>, vector<8x128xf32>,
    %cst_15 = arith.constant 0.000000e+00 : f32
    %16 = vector.broadcast %cst_15 : f32 to vector<8x128xf32>
    %17 = vector.extract_strided_slice %6 {offsets = [0, 0], sizes = [8, 128], strides = [1, 1]} : vector<8x512xf32> to vector<8x128xf32>
    %18 = arith.mulf %17, %17 : vector<8x128xf32>
    %19 = arith.addf %16, %18 : vector<8x128xf32>
    %20 = vector.extract_strided_slice %6 {offsets = [0, 128], sizes = [8, 128], strides = [1, 1]} : vector<8x512xf32> to vector<8x128xf32>
    %21 = arith.mulf %20, %20 : vector<8x128xf32>
    %22 = arith.addf %19, %21 : vector<8x128xf32>
    %23 = vector.extract_strided_slice %6 {offsets = [0, 256], sizes = [8, 128], strides = [1, 1]} : vector<8x512xf32> to vector<8x128xf32>
    %24 = arith.mulf %23, %23 : vector<8x128xf32>
    %25 = arith.addf %22, %24 : vector<8x128xf32>
    %26 = vector.extract_strided_slice %6 {offsets = [0, 384], sizes = [8, 128], strides = [1, 1]} : vector<8x512xf32> to vector<8x128xf32>
    %27 = arith.mulf %26, %26 : vector<8x128xf32>
    %28 = arith.addf %25, %27 : vector<8x128xf32>
    %c0_16 = arith.constant 0 : index
    %c0_17 = arith.constant 0 : index
    %29 = vector.load %arg11[%c0_16, %c0_17] : memref<8x128xf32, #tpu.memory_space<vmem>>, vector<8x128xf32>
    %30 = arith.addf %29, %28 : vector<8x128xf32>
    %c0_18 = arith.constant 0 : index
    %c0_19 = arith.constant 0 : index
    %31 = vector.load %arg11[%c0_18, %c0_19] : memref<8x128xf32, #tpu.memory_space<vmem>>, vector<8x128xf32>
    tpu.vector_store %arg11[%c0_18, %c0_19], %30 {strides = array<i32>} : memref<8x128xf32, #tpu.memory_space<vmem>>, vector<8x128xf32>,
    %c1_i32 = arith.constant 1 : i32
    %32 = arith.cmpi eq, %arg1, %c1_i32 : i32
    %33 = arith.extui %32 : i1 to i32
    %c0_i32_20 = arith.constant 0 : i32
    %34 = arith.cmpi ne, %33, %c0_i32_20 : i32
    scf.if %34 {
      %c0_21 = arith.constant 0 : index
      %c0_22 = arith.constant 0 : index
      %35 = vector.load %arg7[%c0_21, %c0_22] : memref<1x128xf32, #tpu.memory_space<vmem>>, vector<1x128xf32>
      %c0_23 = arith.constant 0 : index
      %c0_24 = arith.constant 0 : index
      %36 = vector.load %arg6[%c0_23, %c0_24] : memref<8x128xf32, #tpu.memory_space<vmem>>, vector<8x128xf32>
      %c0_25 = arith.constant 0 : index
      %c0_26 = arith.constant 0 : index
      %37 = vector.load %arg5[%c0_25, %c0_26] : memref<128x128xf32, #tpu.memory_space<vmem>>, vector<128x128xf32>
      %c0_27 = arith.constant 0 : index
      %c0_28 = arith.constant 0 : index
      %38 = vector.load %arg9[%c0_27, %c0_28] : memref<8x128xf32, #tpu.memory_space<vmem>>, vector<8x128xf32>
      %c0_29 = arith.constant 0 : index
      %c0_30 = arith.constant 0 : index
      %39 = vector.load %arg10[%c0_29, %c0_30] : memref<8x128xf32, #tpu.memory_space<vmem>>, vector<8x128xf32>
      %c0_31 = arith.constant 0 : index
      %c0_32 = arith.constant 0 : index
      %40 = vector.load %arg11[%c0_31, %c0_32] : memref<8x128xf32, #tpu.memory_space<vmem>>, vector<8x128xf32>
      %cst_33 = arith.constant dense<0.000000e+00> : vector<8xf32>
      %41 = vector.multi_reduction <add>, %40, %cst_33 [1] : vector<8x128xf32> to vector<8xf32>
      %42 = vector.shape_cast %41 : vector<8xf32> to vector<8x1xf32>
      %43 = tpu.iota {dimensions = array<i32: 1>} : vector<1x128xi32>
      %c10_i32 = arith.constant 10 : i32
      %44 = vector.broadcast %c10_i32 : i32 to vector<1x128xi32>
      %45 = arith.cmpi slt, %43, %44 : vector<1x128xi32>
      %cst_34 = arith.constant 9.99999996E-13 : f32
      %46 = vector.broadcast %cst_34 : f32 to vector<8x1xf32>
      %47 = arith.maximumf %42, %46 : vector<8x1xf32>
      %48 = math.rsqrt %47 : vector<8x1xf32>
      %49 = vector.broadcast %35 : vector<1x128xf32> to vector<8x128xf32>
      %50 = arith.addf %38, %49 : vector<8x128xf32>
      %cst_35 = arith.constant 9.99999997E-7 : f32
      %51 = vector.broadcast %cst_35 : f32 to vector<8x1xf32>
      %52 = arith.mulf %51, %48 : vector<8x1xf32>
      %53 = vector.broadcast %52 : vector<8x1xf32> to vector<8x128xf32>
      %54 = arith.mulf %53, %39 : vector<8x128xf32>
      %55 = arith.addf %50, %54 : vector<8x128xf32>
      %cst_36 = arith.constant -1.000000e+30 : f32
      %56 = vector.shape_cast %45 : vector<1x128xi1> to vector<1x128xi1>
      %57 = vector.broadcast %56 : vector<1x128xi1> to vector<8x128xi1>
      %58 = vector.broadcast %cst_36 : f32 to vector<8x128xf32>
      %59 = arith.select %57, %55, %58 : vector<8x128xi1>, vector<8x128xf32>
      %cst_37 = arith.constant dense<0xFF800000> : vector<8xf32>
      %60 = vector.multi_reduction <maximumf>, %59, %cst_37 [1] : vector<8x128xf32> to vector<8xf32>
      %61 = vector.shape_cast %60 : vector<8xf32> to vector<8x1xf32>
      %62 = vector.broadcast %61 : vector<8x1xf32> to vector<8x128xf32>
      %63 = arith.subf %59, %62 : vector<8x128xf32>
      %64 = math.exp %63 : vector<8x128xf32>
      %cst_38 = arith.constant dense<0.000000e+00> : vector<8xf32>
      %65 = vector.multi_reduction <add>, %64, %cst_38 [1] : vector<8x128xf32> to vector<8xf32>
      %66 = vector.shape_cast %65 : vector<8xf32> to vector<8x1xf32>
      %67 = vector.broadcast %66 : vector<8x1xf32> to vector<8x128xf32>
      %68 = arith.divf %64, %67 : vector<8x128xf32>
      %cst_39 = arith.constant -1.000000e+30 : f32
      %69 = vector.shape_cast %45 : vector<1x128xi1> to vector<1x128xi1>
      %70 = vector.broadcast %69 : vector<1x128xi1> to vector<8x128xi1>
      %71 = vector.broadcast %cst_39 : f32 to vector<8x128xf32>
      %72 = arith.select %70, %36, %71 : vector<8x128xi1>, vector<8x128xf32>
      %cst_40 = arith.constant dense<0xFF800000> : vector<8xf32>
      %73 = vector.multi_reduction <maximumf>, %72, %cst_40 [1] : vector<8x128xf32> to vector<8xf32>
      %74 = vector.shape_cast %73 : vector<8xf32> to vector<8x1xf32>
      %75 = vector.broadcast %74 : vector<8x1xf32> to vector<8x128xf32>
      %76 = arith.subf %72, %75 : vector<8x128xf32>
      %77 = math.exp %76 : vector<8x128xf32>
      %cst_41 = arith.constant dense<0.000000e+00> : vector<8xf32>
      %78 = vector.multi_reduction <add>, %77, %cst_41 [1] : vector<8x128xf32> to vector<8xf32>
      %79 = vector.shape_cast %78 : vector<8xf32> to vector<8x1xf32>
      %80 = vector.broadcast %79 : vector<8x1xf32> to vector<8x128xf32>
      %81 = arith.divf %77, %80 : vector<8x128xf32>
      %82 = math.log %79 : vector<8x1xf32>
      %83 = arith.addf %74, %82 : vector<8x1xf32>
      %84 = vector.broadcast %83 : vector<8x1xf32> to vector<8x128xf32>
      %85 = arith.subf %72, %84 : vector<8x128xf32>
      %86 = arith.subf %68, %81 : vector<8x128xf32>
      %cst_42 = arith.constant 5.000000e-01 : f32
      %87 = vector.broadcast %cst_42 : f32 to vector<8x128xf32>
      %88 = arith.mulf %86, %87 : vector<8x128xf32>
      %cst_43 = arith.constant dense<0.000000e+00> : vector<8x128xf32>
      %89 = tpu.matmul %88, %37, %cst_43 {dimension_numbers = #tpu.dot_dimension_numbers<[1], [0], [0], [1], [0, 0, 1, 1], [], []>} : vector<8x128xf32>, vector<128x128xf32>, vector<8x128xf32> -> vector<8x128xf32>
      %90 = arith.mulf %88, %89 : vector<8x128xf32>
      %cst_44 = arith.constant dense<0.000000e+00> : vector<8xf32>
      %91 = vector.multi_reduction <add>, %90, %cst_44 [1] : vector<8x128xf32> to vector<8xf32>
      %92 = vector.shape_cast %91 : vector<8xf32> to vector<8x1xf32>
      %cst_45 = arith.constant 9.99999996E-13 : f32
      %93 = vector.broadcast %cst_45 : f32 to vector<8x1xf32>
      %94 = arith.maximumf %92, %93 : vector<8x1xf32>
      %95 = math.rsqrt %94 : vector<8x1xf32>
      %96 = vector.broadcast %35 : vector<1x128xf32> to vector<8x128xf32>
      %97 = arith.addf %38, %96 : vector<8x128xf32>
      %cst_46 = arith.constant 1.000000e+00 : f32
      %98 = vector.broadcast %cst_46 : f32 to vector<8x1xf32>
      %99 = arith.mulf %98, %95 : vector<8x1xf32>
      %100 = vector.broadcast %99 : vector<8x1xf32> to vector<8x128xf32>
      %101 = arith.mulf %100, %89 : vector<8x128xf32>
      %102 = arith.addf %97, %101 : vector<8x128xf32>
      %cst_47 = arith.constant -1.000000e+30 : f32
      %103 = vector.shape_cast %45 : vector<1x128xi1> to vector<1x128xi1>
      %104 = vector.broadcast %103 : vector<1x128xi1> to vector<8x128xi1>
      %105 = vector.broadcast %cst_47 : f32 to vector<8x128xf32>
      %106 = arith.select %104, %102, %105 : vector<8x128xi1>, vector<8x128xf32>
      %cst_48 = arith.constant dense<0xFF800000> : vector<8xf32>
      %107 = vector.multi_reduction <maximumf>, %106, %cst_48 [1] : vector<8x128xf32> to vector<8xf32>
      %108 = vector.shape_cast %107 : vector<8xf32> to vector<8x1xf32>
      %109 = vector.broadcast %108 : vector<8x1xf32> to vector<8x128xf32>
      %110 = arith.subf %106, %109 : vector<8x128xf32>
      %111 = math.exp %110 : vector<8x128xf32>
      %cst_49 = arith.constant dense<0.000000e+00> : vector<8xf32>
      %112 = vector.multi_reduction <add>, %111, %cst_49 [1] : vector<8x128xf32> to vector<8xf32>
      %113 = vector.shape_cast %112 : vector<8xf32> to vector<8x1xf32>
      %114 = math.log %113 : vector<8x1xf32>
      %115 = arith.addf %108, %114 : vector<8x1xf32>
      %116 = vector.broadcast %115 : vector<8x1xf32> to vector<8x128xf32>
      %117 = arith.subf %106, %116 : vector<8x128xf32>
      %118 = arith.subf %85, %117 : vector<8x128xf32>
      %119 = arith.mulf %81, %118 : vector<8x128xf32>
      %cst_50 = arith.constant 0.000000e+00 : f32
      %120 = vector.shape_cast %45 : vector<1x128xi1> to vector<1x128xi1>
      %121 = vector.broadcast %120 : vector<1x128xi1> to vector<8x128xi1>
      %122 = vector.broadcast %cst_50 : f32 to vector<8x128xf32>
      %123 = arith.select %121, %119, %122 : vector<8x128xi1>, vector<8x128xf32>
      %cst_51 = arith.constant dense<0.000000e+00> : vector<8xf32>
      %124 = vector.multi_reduction <add>, %123, %cst_51 [1] : vector<8x128xf32> to vector<8xf32>
      %125 = vector.shape_cast %124 : vector<8xf32> to vector<8x1xf32>
      %126 = tpu.iota {dimensions = array<i32: 0>} : vector<8x1xi32>
      %127 = vector.broadcast %0 : i32 to vector<8x1xi32>
      %128 = arith.addi %126, %127 : vector<8x1xi32>
      %c2_i32 = arith.constant 2 : i32
      %129 = vector.broadcast %c2_i32 : i32 to vector<8x1xi32>
      %130 = arith.cmpi slt, %128, %129 : vector<8x1xi32>
      %cst_52 = arith.constant 0.000000e+00 : f32
      %131 = vector.broadcast %cst_52 : f32 to vector<8x1xf32>
      %132 = arith.select %130, %125, %131 : vector<8x1xi1>, vector<8x1xf32>
      %133 = vector.shape_cast %132 : vector<8x1xf32> to vector<8x1xf32>
      %134 = vector.broadcast %133 : vector<8x1xf32> to vector<8x128xf32>
      %c0_53 = arith.constant 0 : index
      %c0_54 = arith.constant 0 : index
      %135 = vector.load %arg8[%c0_53, %c0_54] : memref<8x128xf32, #tpu.memory_space<vmem>>, vector<8x128xf32>
      tpu.vector_store %arg8[%c0_53, %c0_54], %134 {strides = array<i32>} : memref<8x128xf32, #tpu.memory_space<vmem>>, vector<8x128xf32>,
    } else {
    }
    return
  }
  func.func @transform_0(%arg0: i32, %arg1: i32) -> (i32, i32) {
    %c0_i32 = arith.constant 0 : i32
    return %arg0, %arg1 : i32, i32
  }
  func.func @transform_1(%arg0: i32, %arg1: i32) -> (i32, i32) {
    %c0_i32 = arith.constant 0 : i32
    return %arg0, %arg1 : i32, i32
  }
  func.func @transform_2(%arg0: i32, %arg1: i32) -> (i32, i32) {
    %c0_i32 = arith.constant 0 : i32
    %c0_i32_0 = arith.constant 0 : i32
    return %arg1, %c0_i32 : i32, i32
  }
  func.func @transform_3(%arg0: i32, %arg1: i32) -> (i32, i32) {
    %c0_i32 = arith.constant 0 : i32
    %c0_i32_0 = arith.constant 0 : i32
    %c0_i32_1 = arith.constant 0 : i32
    return %c0_i32, %c0_i32_0 : i32, i32
  }
  func.func @transform_4(%arg0: i32, %arg1: i32) -> (i32, i32) {
    %c0_i32 = arith.constant 0 : i32
    %c0_i32_0 = arith.constant 0 : i32
    return %arg0, %c0_i32 : i32, i32
  }
  func.func @transform_5(%arg0: i32, %arg1: i32) -> (i32, i32) {
    %c0_i32 = arith.constant 0 : i32
    %c0_i32_0 = arith.constant 0 : i32
    %c0_i32_1 = arith.constant 0 : i32
    return %c0_i32, %c0_i32_0 : i32, i32
  }
  func.func @transform_6(%arg0: i32, %arg1: i32) -> (i32, i32) {
    %c0_i32 = arith.constant 0 : i32
    %c0_i32_0 = arith.constant 0 : i32
    return %arg0, %c0_i32 : i32, i32
  }
}

</mosaic_0001>

<bundles_post_ra>
// kernel: tpu_custom_call.1
= control target key start
LH: loop header
LB: loop body
LE: loop exit
PB: predicated region body
PF: predicated region fallthrough
CT: control target
= control target key end

     0   :  { %s2303_s0 = inlined_call_operand.hbm [shape: f32[8,1024], index: 0, kind: input, shape index: {}]   ;;  %s2304_s1 = inlined_call_operand.hbm [shape: bf16[8,1024], index: 1, kind: input, shape index: {}]   ;;  %s2305_s2 = inlined_call_operand.hbm [shape: f32[1024,128], index: 2, kind: input, shape index: {}]   ;;  %s2306_s3 = inlined_call_operand.hbm [shape: f32[128,128], index: 3, kind: input, shape index: {}]   ;;  %s2307_s4 = inlined_call_operand.vmem [shape: f32[8,128], index: 4, kind: input, shape index: {}]   ;;  %s2308_s5 = inlined_call_operand.vmem [shape: f32[1,128], index: 5, kind: input, shape index: {}]   ;;  %s2309_s6 = inlined_call_operand.hbm [shape: f32[8,128], index: 6, kind: output, shape index: {}]  }
   0x1   :  { %2320 = sst [smem:[#allocation22_spill]] %s2304_s1 }
   0x2   :  { %11 = vsyncpa [#allocation6], 0 }
   0x3   :  { %13 = vsyncpa [#allocation6 + $0x1], 0 }
   0x4   :  { %14 = vsyncpa [#allocation9], 0 }
   0x5   :  { %16 = vsyncpa [#allocation9 + $0x1], 0 }
   0x6   :  { %17 = vsyncpa [#allocation12], 0 }
   0x7   :  { %18 = vsyncpa [#allocation7], 0  ;;  %s1819_s21 = smov 0   ;;  %s1821_s22 = smov 0  }
   0x8   :  { %s1823_s23 = smov 0   ;;  %s1825_s24 = smov 0  }
   0x9   :  { %s1827_s25 = smov 0   ;;  %s1829_s26 = smov 0  }
   0xa LB: > { %2321 = sst [smem:[#allocation18_spill]] %s1759_s23  ;;  %s33_s27 = sadd.s32 1, %s1767_s25  ;;  %s1771_s26 = sphi %s1829_s26, %s24_s26   ;;  %s1767_s25 = sphi %s1827_s25, %s2345_s25   ;;  %s1763_s24 = sphi %s1825_s24, %s2344_s24   ;;  %s1759_s23 = sphi %s1823_s23, %s2340_s23   ;;  %s1755_s22 = sphi %s1821_s22, %s2343_s22   ;;  %s1751_s21 = sphi %s1819_s21, %s2342_s21  }
   0xb   : > { %2322 = sst [smem:[#allocation19_spill]] %s1771_s26  ;;  %s45_s28 = sadd.s32 1, %s1759_s23 }
   0xc   : > { %p34_p0 = scmp.ge.s32.totalorder %s33_s27, 2  ;;  %p52_p1 = scmp.ne.s32.totalorder %s1759_s23, %s1755_s22 }
   0xd   : > { %p53_p2 = scmp.eq.s32.totalorder %s1771_s26, 0  ;;  %p1487_p4 = scmp.lt.s32.totalorder %s1771_s26, 2 }
   0xe   : > { %s2347_s27 = smov (%p34_p0, %s33_s27), 0  ;;  %s1860_s30 = sand.u32 1, %s1759_s23  }
   0xf   : > { %2323 = sst [smem:[#allocation20_spill]] %s2347_s27  ;;  %p54_p3 = por %p53_p2, %p52_p1 }
  0x10   : > { %s41_s29 = ssub.s32 %s1767_s25, %s2347_s27  ;;  %s274_s8 = sand.u32 1, %s1771_s26  }
  0x11   : > { %p43_p5 = scmp.eq.s32.totalorder %s41_s29, 0  ;;  %p1862_p6 = pnand %p1487_p4, %p54_p3 }
  0x12   : > { %s1093_s9 = sshll.u32 %s1860_s30, 4  ;;  %s1112_s11 = sshll.u32 %s1767_s25, 8 }
  0x13   : > { %s2324_s7 = scalar_select %p1862_p6, 1, 0 }
  0x14   : > { %s1869_s10 = scalar_select %p43_p5, %s1759_s23, %s45_s28  }
  0x15   : > { %s2326_s1 = sld [smem:[#allocation22_spill]]  ;;  %s278_s15 = scalar_lea.vmem [#allocation8], %s1093_s9 }
  0x16   : > { %2325 = sst [smem:[#allocation21_spill]] %s1869_s10  ;;  %s288_s16 = sshll.u32 %s278_s15, 4  ;;  %s1877_s16 = int_to_ptr.vmem [resolvable:$true] %s288_s16 }
  0x17   : > { %s1880_s18 = scalar_lea.sflag [#allocation9], %s274_s8  ;;  %p1886_p8 = pneg %p1862_p6 }
  0x19   : > { %s2327_s20 = scalar_select %p1886_p8, 1, 0 }
  0x1b   : > { %s1875_s14 = scalar_lea.hbm %s2326_s1, %s1112_s11  ;;  %s1570_s9 = scalar_lea.hbm %s2326_s1, 512 }
  0x1c   : > { %s1565_s19 = scalar_lea.hbm %s1875_s14, 256  ;;  %p1571_p11 = scmp.lt.u32.totalorder %s1875_s14, %s2326_s1 }
  0x1d   : > { %p1566_p7 = scmp.ne.s32.totalorder %s1875_s14, %s1565_s19  ;;  %p1572_p12 = scmp.lt.u32.totalorder %s1570_s9, %s1565_s19 }
  0x1e   : > { %p1574_p0 = scmp.lt.u32.totalorder %s1565_s19, %s1875_s14 }
  0x1f   : > { %p1568_p9 = pnand %p1886_p8, %p1566_p7  ;;  %p1573_p13 = por %p1572_p12, %p1571_p11 }
  0x21   : > { %p1569_p10 = pneg %p1568_p9  ;;  %p1575_p1 = por %p1574_p0, %p1573_p13 }
  0x23   : > { %p1576_p2 = pnand %p1575_p1, %p1569_p10 }
  0x25   : > { %1579 = shalt.err (!%p1576_p2)
}
  0x26   : > { %s1580_s8 = scalar_lea.vmem %s1877_s16, 256  ;;  %s1773_s13 = smov [#allocation8]  }
  0x27   : > { %p1581_p3 = scmp.ne.s32.totalorder %s1877_s16, %s1580_s8  ;;  %s1585_s15 = sshll.u32 %s1773_s13, 4  ;;  %s1586_s15 = int_to_ptr.vmem [resolvable:$false] %s1585_s15 }
  0x28   : > { %s1587_s28 = scalar_lea.vmem %s1586_s15, 512  ;;  %p1588_p7 = scmp.lt.s32.totalorder %s1877_s16, %s1586_s15 }
  0x29   : > { %p1583_p4 = pnand %p1581_p3, %p1886_p8  ;;  %p1589_p9 = scmp.lt.s32.totalorder %s1587_s28, %s1580_s8 }
  0x2b   : > { %p1584_p5 = pneg %p1583_p4  ;;  %p1590_p11 = por %p1589_p9, %p1588_p7 }
  0x2d   : > { %p1591_p12 = pnand %p1590_p11, %p1584_p5 }
  0x2f   : > { %1594 = shalt.err (!%p1591_p12)
}
  0x30   : > { %1482 = dma.hbm_to_vmem [thread:$0]  (!%p1862_p6), %s1875_s14, 256, %s1877_s16, %s1880_s18  }
  0x31   : > { %s1911_s19 = sadd.s32 4294967295, %s1771_s26   ;;  %p58_p10 = scmp.ne.s32.totalorder %s1755_s22, %s1751_s21 }
  0x32   : > { %p2313_p13 = scmp.eq.s32.totalorder %s1911_s19, 0  ;;  %p1086_p0 = scmp.ge.s32.totalorder %s1771_s26, 1 }
  0x33   : > { %p217_p1 = scmp.lt.s32.totalorder %s1771_s26, 3  ;;  %s1774_s14 = smov [#allocation11]  }
  0x34   : > { %p1920_p2 = por %p2313_p13, %p58_p10  ;;  %s229_s16 = sshll.u32 %s1774_s14, 4  ;;  %s1928_s16 = int_to_ptr.vmem [resolvable:$true] %s229_s16 }
  0x35   : > { %p1924_p3 = pnand %p1086_p0, %p217_p1  ;;  %s1090_s21 = sshll.u32 %s1860_s30, 5 }
  0x36   : > { %s2328_s29 = scalar_select %p1920_p2, 1, 0 }
  0x37   : > { %s2329_s9 = scalar_select %p1924_p3, 1, 0 }
  0x38   : > { %p1472_p4 = pneg %p1924_p3  ;;  %s1111_s12 = sshll.u32 %s1767_s25, 9 }
  0x39   : > { %s257_s8 = scalar_lea.vmem [#allocation5], %s1090_s21  ;;  %s1943_s17 = scalar_lea.hbm %s2303_s0, %s1111_s12 }
  0x3a   : > { %p1935_p5 = pnand %p1472_p4, %p2313_p13  ;;  %s267_s13 = sshll.u32 %s257_s8, 4  ;;  %s268_s13 = int_to_ptr.vmem [resolvable:$true] %s267_s13 }
  0x3b   : > { %s1595_s27 = scalar_lea.hbm %s2306_s3, 2048 }
  0x3c   : > { %p1596_p7 = scmp.ne.s32.totalorder %s2306_s3, %s1595_s27  ;;  %p1597_p9 = pneg %p1935_p5 }
  0x3d   : > { %p1602_p10 = scmp.lt.u32.totalorder %s1595_s27, %s2306_s3 }
  0x3e   : > { %p1598_p11 = pnand %p1597_p9, %p1596_p7 }
  0x40   : > { %p1599_p12 = pneg %p1598_p11 }
  0x42   : > { %p1604_p0 = pnand %p1602_p10, %p1599_p12 }
  0x44   : > { %1607 = shalt.err (!%p1604_p0)
}
  0x45   : > { %s1608_s12 = scalar_lea.vmem %s1928_s16, 2048  ;;  %p1616_p2 = scmp.lt.s32.totalorder %s1928_s16, %s1928_s16 }
  0x46   : > { %p1609_p1 = scmp.ne.s32.totalorder %s1928_s16, %s1608_s12  ;;  %p1617_p3 = scmp.lt.s32.totalorder %s1608_s12, %s1608_s12 }
  0x48   : > { %p1611_p4 = pnand %p1609_p1, %p1597_p9  ;;  %p1618_p6 = por %p1617_p3, %p1616_p2 }
  0x4a   : > { %p1612_p13 = pneg %p1611_p4 }
  0x4c   : > { %p1619_p8 = pnand %p1618_p6, %p1612_p13 }
  0x4e   : > { %1622 = shalt.err (!%p1619_p8)
}
  0x4f   : > { %s1775_s1 = smov 128   ;;  %s1776_s23 = smov 8  }
  0x50   : > { %1475 = dma.hbm_to_vmem [thread:$0]  (!%p1935_p5), %s2306_s3, 2048, %s1928_s16, [#allocation12], %s1775_s1, %s1775_s1, %s1776_s23  }
  0x51   : > { %s254_s10 = scalar_lea.sflag [#allocation6], %s1860_s30  ;;  %s1623_s8 = scalar_lea.hbm %s1943_s17, 512 }
  0x52   : > { %p1624_p6 = scmp.ne.s32.totalorder %s1943_s17, %s1623_s8  ;;  %p2331_p8 = scmp.ne.s32.totalorder %s2327_s20, 0 }
  0x53   : > { %s1628_s14 = scalar_lea.hbm %s2303_s0, 1024  ;;  %p1629_p3 = scmp.lt.u32.totalorder %s1943_s17, %s2303_s0 }
  0x54   : > { %p1626_p13 = pnand %p1624_p6, %p2331_p8  ;;  %p1630_p7 = scmp.lt.u32.totalorder %s1628_s14, %s1623_s8 }
  0x55   : > { %p1632_p11 = scmp.lt.u32.totalorder %s1623_s8, %s1943_s17 }
  0x56   : > { %p1627_p2 = pneg %p1626_p13  ;;  %p1631_p9 = por %p1630_p7, %p1629_p3 }
  0x58   : > { %p1633_p12 = por %p1632_p11, %p1631_p9 }
  0x5a   : > { %p1634_p5 = pnand %p1633_p12, %p1627_p2 }
  0x5c   : > { %1637 = shalt.err (!%p1634_p5)
}
  0x5d   : > { %s1638_s16 = scalar_lea.vmem %s268_s13, 512  ;;  %s1777_s12 = smov [#allocation5]  }
  0x5e   : > { %p1639_p10 = scmp.ne.s32.totalorder %s268_s13, %s1638_s16  ;;  %s1643_s26 = sshll.u32 %s1777_s12, 4  ;;  %s1644_s26 = int_to_ptr.vmem [resolvable:$false] %s1643_s26 }
  0x5f   : > { %s1645_s27 = scalar_lea.vmem %s1644_s26, 1024  ;;  %p1646_p4 = scmp.lt.s32.totalorder %s268_s13, %s1644_s26 }
  0x60   : > { %p1641_p0 = pnand %p1639_p10, %p2331_p8  ;;  %p1647_p6 = scmp.lt.s32.totalorder %s1645_s27, %s1638_s16 }
  0x62   : > { %p1642_p1 = pneg %p1641_p0  ;;  %p1648_p13 = por %p1647_p6, %p1646_p4 }
  0x64   : > { %p1649_p3 = pnand %p1648_p13, %p1642_p1 }
  0x66   : > { %1652 = shalt.err (!%p1649_p3)
}
  0x67   : > { %p2332_p7 = scmp.ne.s32.totalorder %s2324_s7, 0  ;;  %s1113_s8 = sshll.u32 %s1767_s25, 13 }
  0x68   : > { %s2333_s15 = sshll.u32 %s1860_s30, 9  ;;  %s1993_s12 = scalar_lea.hbm %s2305_s2, %s1113_s8 }
  0x69   : > { %1479 = dma.hbm_to_vmem [thread:$0]  (!%p2332_p7), %s1943_s17, 512, %s268_s13, %s254_s10  }
  0x6a   : > { %s299_s28 = scalar_lea.vmem [#allocation10], %s2333_s15  ;;  %s1653_s16 = scalar_lea.hbm %s1993_s12, 8192 }
  0x6b   : > { %s306_s14 = sshll.u32 %s299_s28, 4  ;;  %p1654_p2 = scmp.ne.s32.totalorder %s1993_s12, %s1653_s16  ;;  %s1995_s14 = int_to_ptr.vmem [resolvable:$true] %s306_s14 }
  0x6c   : > { %s1658_s13 = scalar_lea.hbm %s2305_s2, 16384  ;;  %p1659_p12 = scmp.lt.u32.totalorder %s1993_s12, %s2305_s2 }
  0x6d   : > { %p1656_p9 = pnand %p1654_p2, %p2331_p8  ;;  %p1660_p5 = scmp.lt.u32.totalorder %s1658_s13, %s1653_s16 }
  0x6e   : > { %p1662_p0 = scmp.lt.u32.totalorder %s1653_s16, %s1993_s12 }
  0x6f   : > { %p1657_p11 = pneg %p1656_p9  ;;  %p1661_p10 = por %p1660_p5, %p1659_p12 }
  0x71   : > { %p1663_p1 = por %p1662_p0, %p1661_p10 }
  0x73   : > { %p1664_p4 = pnand %p1663_p1, %p1657_p11 }
  0x75   : > { %1667 = shalt.err (!%p1664_p4)
}
  0x76   : > { %s1668_s27 = scalar_lea.vmem %s1995_s14, 8192  ;;  %s1778_s8 = smov [#allocation10]  }
  0x77   : > { %p1669_p6 = scmp.ne.s32.totalorder %s1995_s14, %s1668_s27  ;;  %s1673_s15 = sshll.u32 %s1778_s8, 4  ;;  %s1674_s15 = int_to_ptr.vmem [resolvable:$false] %s1673_s15 }
  0x78   : > { %s1675_s28 = scalar_lea.vmem %s1674_s15, 16384  ;;  %p1676_p2 = scmp.lt.s32.totalorder %s1995_s14, %s1674_s15 }
  0x79   : > { %p1671_p13 = pnand %p1669_p6, %p2331_p8  ;;  %p1677_p9 = scmp.lt.s32.totalorder %s1675_s28, %s1668_s27 }
  0x7b   : > { %p1672_p3 = pneg %p1671_p13  ;;  %p1678_p12 = por %p1677_p9, %p1676_p2 }
  0x7d   : > { %p1679_p5 = pnand %p1678_p12, %p1672_p3 }
  0x7f   : > { %1682 = shalt.err (!%p1679_p5)
}
  0x80   : > { %1485 = dma.hbm_to_vmem [thread:$0]  (!%p2332_p7), %s1993_s12, 8192, %s1995_s14, %s1880_s18, %s1775_s1, %s1775_s1, %s1776_s23  }
  0x81   : > { %p2334_p8 = scmp.ne.s32.totalorder %s2329_s9, 0 }
  0x82   : > { %s320_s20 = sand.u32 (!%p2334_p8), 1, %s1755_s22   ;;  %p2335_p11 = scmp.ne.s32.totalorder (!%p2334_p8), %s2328_s29, 0 }
  0x83   : > { %318 = sbr.rel (%p2334_p8) target bundleno = 1635 (0x663), region = 44  ;;  %s1100_s21 = sshll.u32 (!%p2334_p8), %s320_s20, 5 }
  0x84   : > { %s321_s11 = scalar_lea.sflag (!%p2334_p8), [#allocation6], %s320_s20  ;;  %s2025_s16 = scalar_lea.vmem (!%p2334_p8), [#allocation5], %s1100_s21 }
  0x8a   : > { %1734 = dma.done.wait (%p2335_p11), %s321_s11, 512  }
  0x8b   : > { %1736 = vsyncadd (%p2335_p11), %s321_s11, 4294966784  ;;  %s329_s7 = sand.u32 1, %s1911_s19   ;;  %s1101_s17 = sshll.u32 %s320_s20, 4 }
  0x8c   : > { %s330_s18 = scalar_lea.sflag [#allocation9], %s329_s7  ;;  %s2032_s1 = scalar_lea.vmem [#allocation8], %s1101_s17 }
  0x8d   : > { %1738 = dma.done.wait (%p2335_p11), %s330_s18, 8448  }
  0x8e   : > { %1740 = vsyncadd (%p2335_p11), %s330_s18, 4294958848  ;;  %s1102_s9 = sshll.u32 %s320_s20, 9  ;;  %p2336_p7 = scmp.eq.s32.totalorder %s1911_s19, 0 }
  0x8f   : > { %s2038_s23 = scalar_lea.vmem [#allocation10], %s1102_s9 }
  0x90   : > { %1742 = dma.done.wait (%p2336_p7), [#allocation12], 2048   ;;  %p2337_p10 = pmov %p2336_p7 }
  0x91   : > { %p1104_p0 = scmp.ne.s32.totalorder %s1763_s24, 0 }
  0x92   : > { %1744 = vsyncadd (%p2337_p10), [#allocation12], 4294965248  ;;  %v1779_v0 = vmov (!%p1104_p0), 0.0  }
  0x93   : > { %395 = sbr.rel (%p1104_p0) target bundleno = 154 (0x9a), region = 64  ;;  %396 = vst [vmem:[#allocation2] sm:$0xff] (!%p1104_p0), %v1779_v0  ;;  %397 = vst [vmem:[#allocation3] sm:$0xff] (!%p1104_p0), %v1779_v0 }
  0x94   : > { %398 = vst [vmem:[#allocation4] sm:$0xff] (!%p1104_p0), %v1779_v0 }
  0x9a PF: > { %v425_v1 = vld [vmem:[%s2038_s23 + $0x80] sm:$0xff]  ;;  %v426_v2 = vld [vmem:[%s2038_s23 + $0x88] sm:$0xff]  ;;  %v427_v12 = vld [vmem:[%s2038_s23 + $0x90] sm:$0xff]  ;;  %p1105_p1 = scmp.ne.s32.totalorder %s1763_s24, 1 }
  0x9b   : > { %v457_v3 = vld [vmem:[%s2038_s23 + $0x180] sm:$0xff]  ;;  %v2048_v4 = vpack.c.bf16 %v426_v2, %v425_v1  ;;  %v458_v5 = vld [vmem:[%s2038_s23 + $0x188] sm:$0xff]  ;;  %v428_v14 = vld [vmem:[%s2038_s23 + $0x98] sm:$0xff]  ;;  %vm1781_vm1 = vmmov (!%p1105_p1), 0  }
  0x9c   : > { %v409_v6 = vld [vmem:[%s2038_s23] sm:$0xff]  ;;  %v410_v7 = vld [vmem:[%s2038_s23 + $0x8] sm:$0xff]  ;;  %v2053_v8 = vpack.c.bf16 %v458_v5, %v457_v3  ;;  %v459_v15 = vld [vmem:[%s2038_s23 + $0x190] sm:$0xff]  ;;  %v2068_v17 = vpack.c.bf16 %v428_v14, %v427_v12 }
  0x9d   : > { %v2055_v9 = vpack.c.bf16 %v410_v7, %v409_v6  ;;  %v441_v10 = vld [vmem:[%s2038_s23 + $0x100] sm:$0xff]  ;;  %v442_v11 = vld [vmem:[%s2038_s23 + $0x108] sm:$0xff]  ;;  %1307 = vmatprep.subr.bf16.mxu0 %v2048_v4  ;;  %v460_v16 = vld [vmem:[%s2038_s23 + $0x198] sm:$0xff] }
  0x9e   : > { %v2061_v13 = vpack.c.bf16 %v442_v11, %v441_v10  ;;  %1339 = vmatprep.subr.bf16.mxu1 %v2053_v8  ;;  %v2070_v18 = vpack.c.bf16 %v460_v16, %v459_v15  ;;  %v411_v19 = vld [vmem:[%s2038_s23 + $0x10] sm:$0xff]  ;;  %v412_v20 = vld [vmem:[%s2038_s23 + $0x18] sm:$0xff]  ;;  %v429_v24 = vld [vmem:[%s2038_s23 + $0xa0] sm:$0xff] }
  0x9f   : > { %1309 = vmatpush3.bf16.msra.mxu0 %v2055_v9  ;;  %v443_v21 = vld [vmem:[%s2038_s23 + $0x110] sm:$0xff]  ;;  %v2076_v22 = vpack.c.bf16 %v412_v20, %v411_v19  ;;  %v444_v23 = vld [vmem:[%s2038_s23 + $0x118] sm:$0xff]  ;;  %v430_v25 = vld [vmem:[%s2038_s23 + $0xa8] sm:$0xff] }
  0xa0   : > { %1341 = vmatpush3.bf16.msra.mxu1 %v2061_v13  ;;  %1311 = vmatprep.subr.bf16.mxu0 %v2068_v17  ;;  %v2083_v26 = vpack.c.bf16 %v444_v23, %v443_v21  ;;  %v2085_v27 = vpack.c.bf16 %v430_v25, %v429_v24  ;;  %v461_v28 = vld [vmem:[%s2038_s23 + $0x1a0] sm:$0xff]  ;;  %v462_v29 = vld [vmem:[%s2038_s23 + $0x1a8] sm:$0xff]  ;;  %v431_v36 = vld [vmem:[%s2038_s23 + $0xb0] sm:$0xff] }
  0xa1   : > { %1343 = vmatprep.subr.bf16.mxu1 %v2070_v18  ;;  %v413_v30 = vld [vmem:[%s2038_s23 + $0x20] sm:$0xff]  ;;  %v2090_v31 = vpack.c.bf16 %v462_v29, %v461_v28  ;;  %v414_v32 = vld [vmem:[%s2038_s23 + $0x28] sm:$0xff]  ;;  %v432_v37 = vld [vmem:[%s2038_s23 + $0xb8] sm:$0xff] }
  0xa2   : > { %v445_v33 = vld [vmem:[%s2038_s23 + $0x120] sm:$0xff]  ;;  %v446_v34 = vld [vmem:[%s2038_s23 + $0x128] sm:$0xff]  ;;  %v2096_v35 = vpack.c.bf16 %v414_v32, %v413_v30  ;;  %v463_v38 = vld [vmem:[%s2038_s23 + $0x1b0] sm:$0xff]  ;;  %v2105_v40 = vpack.c.bf16 %v432_v37, %v431_v36 }
  0xa3   : > { %1313 = vmatpush3.bf16.msra.mxu0 %v2076_v22  ;;  %v2103_v39 = vpack.c.bf16 %v446_v34, %v445_v33  ;;  %v464_v41 = vld [vmem:[%s2038_s23 + $0x1b8] sm:$0xff]  ;;  %v415_v42 = vld [vmem:[%s2038_s23 + $0x30] sm:$0xff]  ;;  %v433_v47 = vld [vmem:[%s2038_s23 + $0xc0] sm:$0xff] }
  0xa4   : > { %1345 = vmatpush3.bf16.msra.mxu1 %v2083_v26  ;;  %1315 = vmatprep.subr.bf16.mxu0 %v2085_v27  ;;  %v416_v43 = vld [vmem:[%s2038_s23 + $0x38] sm:$0xff]  ;;  %v2111_v44 = vpack.c.bf16 %v464_v41, %v463_v38  ;;  %v447_v45 = vld [vmem:[%s2038_s23 + $0x130] sm:$0xff]  ;;  %v434_v48 = vld [vmem:[%s2038_s23 + $0xc8] sm:$0xff] }
  0xa5   : > { %1347 = vmatprep.subr.bf16.mxu1 %v2090_v31  ;;  %v448_v46 = vld [vmem:[%s2038_s23 + $0x138] sm:$0xff]  ;;  %v465_v49 = vld [vmem:[%s2038_s23 + $0x1c0] sm:$0xff]  ;;  %v466_v50 = vld [vmem:[%s2038_s23 + $0x1c8] sm:$0xff]  ;;  %v2120_v51 = vpack.c.bf16 %v416_v43, %v415_v42  ;;  %v2126_v53 = vpack.c.bf16 %v434_v48, %v433_v47 }
  0xa6   : > { %v2124_v52 = vpack.c.bf16 %v448_v46, %v447_v45  ;;  %v417_v54 = vld [vmem:[%s2038_s23 + $0x40] sm:$0xff]  ;;  %v418_v55 = vld [vmem:[%s2038_s23 + $0x48] sm:$0xff]  ;;  %v2132_v57 = vpack.c.bf16 %v466_v50, %v465_v49  ;;  %v435_v59 = vld [vmem:[%s2038_s23 + $0xd0] sm:$0xff] }
  0xa7   : > { %1317 = vmatpush3.bf16.msra.mxu0 %v2096_v35  ;;  %v449_v56 = vld [vmem:[%s2038_s23 + $0x140] sm:$0xff]  ;;  %v450_v58 = vld [vmem:[%s2038_s23 + $0x148] sm:$0xff]  ;;  %v436_v60 = vld [vmem:[%s2038_s23 + $0xd8] sm:$0xff]  ;;  %v2140_v63 = vpack.c.bf16 %v418_v55, %v417_v54 }
  0xa8   : > { %1349 = vmatpush3.bf16.msra.mxu1 %v2103_v39  ;;  %1319 = vmatprep.subr.bf16.mxu0 %v2105_v40  ;;  %v467_v61 = vld [vmem:[%s2038_s23 + $0x1d0] sm:$0xff]  ;;  %v468_v62 = vld [vmem:[%s2038_s23 + $0x1d8] sm:$0xff]  ;;  %v2144_v0 = vpack.c.bf16 %v450_v58, %v449_v56  ;;  %v2146_v1 = vpack.c.bf16 %v436_v60, %v435_v59  ;;  %v437_v10 = vld [vmem:[%s2038_s23 + $0xe0] sm:$0xff] }
  0xa9   : > { %1351 = vmatprep.subr.bf16.mxu1 %v2111_v44  ;;  %v419_v2 = vld [vmem:[%s2038_s23 + $0x50] sm:$0xff]  ;;  %v420_v3 = vld [vmem:[%s2038_s23 + $0x58] sm:$0xff]  ;;  %v2152_v6 = vpack.c.bf16 %v468_v62, %v467_v61  ;;  %v438_v11 = vld [vmem:[%s2038_s23 + $0xe8] sm:$0xff] }
  0xaa   : > { %v451_v5 = vld [vmem:[%s2038_s23 + $0x150] sm:$0xff]  ;;  %v452_v7 = vld [vmem:[%s2038_s23 + $0x158] sm:$0xff]  ;;  %v469_v12 = vld [vmem:[%s2038_s23 + $0x1e0] sm:$0xff]  ;;  %v2160_v15 = vpack.c.bf16 %v420_v3, %v419_v2  ;;  %v2169_v23 = vpack.c.bf16 %v438_v11, %v437_v10 }
  0xab   : > { %1321 = vmatpush3.bf16.msra.mxu0 %v2120_v51  ;;  %v470_v14 = vld [vmem:[%s2038_s23 + $0x1e8] sm:$0xff]  ;;  %v421_v16 = vld [vmem:[%s2038_s23 + $0x60] sm:$0xff]  ;;  %v2167_v21 = vpack.c.bf16 %v452_v7, %v451_v5  ;;  %v402_v28 = vld [vmem:[%s2025_s16 + $0x18] sm:$0xff] }
  0xac   : > { %1353 = vmatpush3.bf16.msra.mxu1 %v2124_v52  ;;  %1323 = vmatprep.subr.bf16.mxu0 %v2126_v53  ;;  %v422_v19 = vld [vmem:[%s2038_s23 + $0x68] sm:$0xff]  ;;  %v453_v20 = vld [vmem:[%s2038_s23 + $0x160] sm:$0xff]  ;;  %v2175_v29 = vpack.c.bf16 %v470_v14, %v469_v12  ;;  %v439_v30 = vld [vmem:[%s2038_s23 + $0xf0] sm:$0xff] }
  0xad   : > { %1355 = vmatprep.subr.bf16.mxu1 %v2132_v57  ;;  %v454_v24 = vld [vmem:[%s2038_s23 + $0x168] sm:$0xff]  ;;  %v440_v32 = vld [vmem:[%s2038_s23 + $0xf8] sm:$0xff]  ;;  %v403_v33 = vld [vmem:[%s2032_s1] sm:$0xff]  ;;  %608 = vmatprep.mubr.f32.mxu1 %v402_v28  ;;  %v1332_v42 = vpack.c.bf16 %v422_v19, %v421_v16 }
  0xae   : > { %v400_v25 = vld [vmem:[%s2025_s16 + $0x8] sm:$0xff]  ;;  %v471_v34 = vld [vmem:[%s2038_s23 + $0x1f0] sm:$0xff]  ;;  %v472_v36 = vld [vmem:[%s2038_s23 + $0x1f8] sm:$0xff]  ;;  %v2182_v37 = vunpack.c.l.bf16 %v403_v33  ;;  %v406_v38 = vunpack.c.h.bf16 %v403_v33  ;;  %v1364_v43 = vpack.c.bf16 %v454_v24, %v453_v20  ;;  %v1334_v46 = vpack.c.bf16 %v440_v32, %v439_v30 }
  0xaf   : > { %1325 = vmatpush3.bf16.msra.mxu0 %v2140_v63  ;;  %538 = vmatprep.mubr.f32.mxu0 %v400_v25  ;;  %v404_v41 = vld [vmem:[%s2032_s1 + $0x8] sm:$0xff]  ;;  %v423_v47 = vld [vmem:[%s2038_s23 + $0x70] sm:$0xff]  ;;  %v1366_v55 = vpack.c.bf16 %v472_v36, %v471_v34  ;;  %v399_v10 = vld [vmem:[%s2025_s16] sm:$0xff] }
  0xb0   : > { %1357 = vmatpush3.bf16.msra.mxu1 %v2144_v0  ;;  %1327 = vmatprep.subr.bf16.mxu0 %v2146_v1  ;;  %v2186_v45 = vunpack.c.l.bf16 %v404_v41  ;;  %v424_v48 = vld [vmem:[%s2038_s23 + $0x78] sm:$0xff]  ;;  %v759_v49 = vmul.f32 %v2182_v37, %v2182_v37  ;;  %v761_v50 = vmul.f32 %v406_v38, %v406_v38  ;;  %v408_v54 = vunpack.c.h.bf16 %v404_v41  ;;  %v455_v56 = vld [vmem:[%s2038_s23 + $0x170] sm:$0xff] }
  0xb1   : > { %1359 = vmatprep.subr.bf16.mxu1 %v2152_v6  ;;  %v456_v58 = vld [vmem:[%s2038_s23 + $0x178] sm:$0xff]  ;;  %v1336_v62 = vpack.c.bf16 %v424_v48, %v423_v47  ;;  %v401_v11 = vld [vmem:[%s2025_s16 + $0x10] sm:$0xff]  ;;  %v780_v47 = vld [vmem:[#allocation11 + $0x20] sm:$0xff] (!%p1105_p1) }
  0xb2   : > { %v763_v59 = vmul.f32 %v2186_v45, %v2186_v45  ;;  %v762_v60 = vadd.f32 %v761_v50, %v759_v49  ;;  %v765_v61 = vmul.f32 %v408_v54, %v408_v54  ;;  %v1368_v2 = vpack.c.bf16 %v456_v58, %v455_v56  ;;  %v767_v5 = vld [vmem:[#allocation4] sm:$0xff]  ;;  %v778_v41 = vld [vmem:[#allocation11 + $0x10] sm:$0xff] (!%p1105_p1)  ;;  %v781_v48 = vld [vmem:[#allocation11 + $0x28] sm:$0xff] (!%p1105_p1) }
  0xb3   : > { %1329 = vmatpush3.bf16.msra.mxu0 %v2160_v15  ;;  %v1441_v49 = vpack.c.bf16 (!%p1105_p1), %v781_v48, %v780_v47  ;;  %v782_v50 = vld [vmem:[#allocation11 + $0x30] sm:$0xff] (!%p1105_p1) }
  0xb4   : > { %1361 = vmatpush3.bf16.msra.mxu1 %v2167_v21  ;;  %1331 = vmatprep.subr.bf16.mxu0 %v2169_v23  ;;  %v764_v3 = vadd.f32 %v763_v59, %v762_v60 }
  0xb5   : > { %1363 = vmatprep.subr.bf16.mxu1 %v2175_v29 }
  0xb6   : > { %v766_v7 = vadd.f32 %v765_v61, %v764_v3  ;;  %v784_v61 = vld [vmem:[#allocation11 + $0x40] sm:$0xff] (!%p1105_p1) }
  0xb7   : > { %1333 = vmatpush3.bf16.msra.mxu0 %v1332_v42 }
  0xb8   : > { %1365 = vmatpush3.bf16.msra.mxu1 %v1364_v43  ;;  %1335 = vmatprep.subr.bf16.mxu0 %v1334_v46  ;;  %v768_v12 = vadd.f32 %v767_v5, %v766_v7  ;;  %v787_v5 = vld [vmem:[#allocation11 + $0x58] sm:$0xff] (!%p1105_p1)  ;;  %v1782_v7 = vmov (!%p1105_p1), 0.0  }
  0xb9   : > { %1367 = vmatprep.subr.bf16.mxu1 %v1366_v55 }
  0xba   : > { %769 = vst [vmem:[#allocation4] sm:$0xff] %v768_v12  ;;  %v789_v12 = vld [vmem:[#allocation11 + $0x68] sm:$0xff] (!%p1105_p1) }
  0xbb   : > { %1337 = vmatpush3.bf16.msra.mxu0 %v1336_v62 }
  0xbc   : > { %1369 = vmatpush3.bf16.msra.mxu1 %v1368_v2  ;;  %1371 = vmatprep.subr.bf16.mxu0 %v2048_v4 }
  0xbd   : > { %1403 = vmatprep.subr.bf16.mxu1 %v2053_v8 }
  0xbe   : > { %539 = vmatmul.mubr.f32.vlgmr.msra.gmra.mrb[0].mxu0 %v399_v10 }
  0xbf   : > { %609 = vmatmul.mubr.f32.vlgmr.msra.gmra.mrb[0].mxu1 %v401_v11  ;;  %1373 = vmatpush3.bf16.msra.mxu0 %v2055_v9  ;;  %v788_v11 = vld [vmem:[#allocation11 + $0x60] sm:$0xff] (!%p1105_p1) }
  0xc0   : > { %1405 = vmatpush3.bf16.msra.mxu1 %v2061_v13  ;;  %1375 = vmatprep.subr.bf16.mxu0 %v2068_v17 }
  0xc1   : > { %1407 = vmatprep.subr.bf16.mxu1 %v2070_v18  ;;  %681 = vmatprep.mubr.f32.mxu0 %v406_v38  ;;  %v777_v38 = vld [vmem:[#allocation11 + $0x8] sm:$0xff] (!%p1105_p1) }
  0xc2   : > { %751 = vmatprep.mubr.f32.mxu1 %v408_v54  ;;  %v783_v54 = vld [vmem:[#allocation11 + $0x38] sm:$0xff] (!%p1105_p1) }
  0xc3   : > { %1377 = vmatpush3.bf16.msra.mxu0 %v2076_v22  ;;  %v473_v22 = vld [vmem:[#allocation2] sm:$0xff] }
  0xc4   : > { %1409 = vmatpush3.bf16.msra.mxu1 %v2083_v26  ;;  %1379 = vmatprep.subr.bf16.mxu0 %v2085_v27 }
  0xc5   : > { %1411 = vmatprep.subr.bf16.mxu1 %v2090_v31 }
  0xc7   : > { %1381 = vmatpush3.bf16.msra.mxu0 %v2096_v35 }
  0xc8   : > { %1413 = vmatpush3.bf16.msra.mxu1 %v2103_v39  ;;  %1383 = vmatprep.subr.bf16.mxu0 %v2105_v40 }
  0xc9   : > { %1415 = vmatprep.subr.bf16.mxu1 %v2111_v44 }
  0xcb   : > { %1385 = vmatpush3.bf16.msra.mxu0 %v2120_v51 }
  0xcc   : > { %1417 = vmatpush3.bf16.msra.mxu1 %v2124_v52  ;;  %1387 = vmatprep.subr.bf16.mxu0 %v2126_v53  ;;  %v616_v52 = vld [vmem:[#allocation3] sm:$0xff] }
  0xcd   : > { %1419 = vmatprep.subr.bf16.mxu1 %v2132_v57 }
  0xcf   : > { %1389 = vmatpush3.bf16.msra.mxu0 %v2140_v63  ;;  %v794_v63 = vld [vmem:[#allocation4] sm:$0xff] (!%p1105_p1) }
  0xd0   : > { %1421 = vmatpush3.bf16.msra.mxu1 %v2144_v0  ;;  %1391 = vmatprep.subr.bf16.mxu0 %v2146_v1  ;;  %v797_v0 = vlaneseq (!%p1105_p1)  ;;  %v775_v1 = vld [vmem:[%s2307_s4] sm:$0xff] (!%p1105_p1) }
  0xd1   : > { %1423 = vmatprep.subr.bf16.mxu1 %v2152_v6  ;;  %795 = vadd.xlane.f32.xlu0 (!%p1105_p1), %v794_v63 }
  0xd2   : > { %v2234_v6 = vand.u32 (!%p1105_p1), 127, %v797_v0 }
  0xd3   : > { %1393 = vmatpush3.bf16.msra.mxu0 %v2160_v15 }
  0xd4   : > { %1425 = vmatpush3.bf16.msra.mxu1 %v2167_v21  ;;  %1395 = vmatprep.subr.bf16.mxu0 %v2169_v23  ;;  %vm799_vm0 = vcmp.lt.s32.totalorder (!%p1105_p1), %v2234_v6, 10  ;;  %v1106_v23 = vld [vmem:[%s2308_s5] ss:$0 sm:$0xff] (!%p1105_p1) }
  0xd5   : > { %1427 = vmatprep.subr.bf16.mxu1 %v2175_v29  ;;  %v2239_v14 = vsel (!%p1105_p1), %vm799_vm0, %v775_v1, -1e+30 }
  0xd6   : > { %825 = vmax.xlane.f32.xlu1 (!%p1105_p1), %v2239_v14 }
  0xd7   : > { %1397 = vmatpush3.bf16.msra.mxu0 %v1332_v42  ;;  %v1780_v42 = vmov (!%p1105_p1), 0.0|0.0  }
  0xd8   : > { %1429 = vmatpush3.bf16.msra.mxu1 %v1364_v43  ;;  %1399 = vmatprep.subr.bf16.mxu0 %v1334_v46 }
  0xd9   : > { %1431 = vmatprep.subr.bf16.mxu1 %v1366_v55  ;;  %v1444_v55 = vpack.c.bf16 (!%p1105_p1), %v783_v54, %v782_v50 }
  0xdb   : > { %1401 = vmatpush3.bf16.msra.mxu0 %v1336_v62  ;;  %v785_v62 = vld [vmem:[#allocation11 + $0x48] sm:$0xff] (!%p1105_p1) }
  0xdc   : > { %1433 = vmatpush3.bf16.msra.mxu1 %v1368_v2  ;;  %1434 = vmatprep.subr.bf16.mxu0 (!%p1105_p1), %v1780_v42  ;;  %v786_v2 = vld [vmem:[#allocation11 + $0x50] sm:$0xff] (!%p1105_p1)  ;;  %v1447_v3 = vpack.c.bf16 (!%p1105_p1), %v785_v62, %v784_v61 }
  0xdd   : > { %v1450_v10 = vpack.c.bf16 (!%p1105_p1), %v787_v5, %v786_v2 }
  0xde   : > { %682 = vmatmul.mubr.f32.vlgmr.msra.gmra.mrb[2].mxu0 %v2182_v37  ;;  %v776_v37 = vld [vmem:[#allocation11] sm:$0xff] (!%p1105_p1) }
  0xdf   : > { %752 = vmatmul.mubr.f32.vlgmr.msra.gmra.mrb[2].mxu1 %v2186_v45  ;;  %v1435_v43 = vpack.c.bf16 (!%p1105_p1), %v777_v38, %v776_v37  ;;  %v779_v45 = vld [vmem:[#allocation11 + $0x18] sm:$0xff] (!%p1105_p1)  ;;  %1303 = vmatprep.mubr.msk.f32.mxu0 (!%p1105_p1), %vm1781_vm1, %v1782_v7 }
  0xe0   : > { %v1438_v46 = vpack.c.bf16 (!%p1105_p1), %v779_v45, %v778_v41 }
  0xe1   : > { %1436 = vmatpush3.bf16.msra.mxu0 (!%p1105_p1), %v1435_v43 }
  0xe2   : > { %1437 = vmatprep.subr.bf16.mxu0 (!%p1105_p1), %v1780_v42 }
  0xe5   : > { %1439 = vmatpush3.bf16.msra.mxu0 (!%p1105_p1), %v1438_v46 }
  0xe6   : > { %1440 = vmatprep.subr.bf16.mxu0 (!%p1105_p1), %v1780_v42 }
  0xe9   : > { %1442 = vmatpush3.bf16.msra.mxu0 (!%p1105_p1), %v1441_v49 }
  0xea   : > { %1443 = vmatprep.subr.bf16.mxu0 (!%p1105_p1), %v1780_v42 }
  0xed   : > { %1445 = vmatpush3.bf16.msra.mxu0 (!%p1105_p1), %v1444_v55 }
  0xee   : > { %1446 = vmatprep.subr.bf16.mxu0 (!%p1105_p1), %v1780_v42 }
  0xf1   : > { %1448 = vmatpush3.bf16.msra.mxu0 (!%p1105_p1), %v1447_v3 }
  0xf2   : > { %1449 = vmatprep.subr.bf16.mxu0 (!%p1105_p1), %v1780_v42 }
  0xf5   : > { %1451 = vmatpush3.bf16.msra.mxu0 (!%p1105_p1), %v1450_v10 }
  0xf6   : > { %1452 = vmatprep.subr.bf16.mxu0 (!%p1105_p1), %v1780_v42 }
 0x15e   : > { %v796_v15 = vpop.xlane.xlu0 (!%p1105_p1), %795 }
 0x15f   : > { %v800_v16 = vmax.f32 (!%p1105_p1), %v796_v15, 1e-12 }
 0x161   : > { %1547 = vrsqrt.f32 (!%p1105_p1), %v800_v16 }
 0x163   : > { %v2242_v19 = vpop.xlane.xlu1 (!%p1105_p1), %825 }
 0x164   : > { %v827_v20 = vsub.f32 (!%p1105_p1), %v2239_v14, %v2242_v19 }
 0x166   : > { %v828_v21 = vmul.f32 (!%p1105_p1), 1.442695, %v827_v20 }
 0x168   : > { %1549 = vpow2.f32 (!%p1105_p1), %v828_v21 }
 0x16b   : > { %v1548_v25 = vpop.eup (!%p1105_p1), %1547 }
 0x16c   : > { %v809_v29 = vmul.f32 (!%p1105_p1), 1e-06, %v1548_v25 }
 0x172   : > { %v1550_v36 = vpop.eup (!%p1105_p1), %1549 }
 0x191   : > { %v1146_v4 = vpop.f32.mrb[0].mxu0 }
 0x192   : > { %v1181_v8 = vpop.f32.mrb[0].mxu1  ;;  %v1147_v9 = vpop.f32.mrb[1].mxu0 }
 0x193   : > { %v1148_v13 = vadd.f32 %v1147_v9, %v1146_v4  ;;  %v1182_v17 = vpop.f32.mrb[1].mxu1  ;;  %v1453_v4 = vpack.c.bf16 (!%p1105_p1), %v789_v12, %v788_v11  ;;  %v791_v9 = vld [vmem:[#allocation11 + $0x78] sm:$0xff] (!%p1105_p1) }
 0x194   : > { %v1183_v18 = vadd.f32 %v1182_v17, %v1181_v8  ;;  %v790_v8 = vld [vmem:[#allocation11 + $0x70] sm:$0xff] (!%p1105_p1) }
 0x195   : > { %1454 = vmatpush3.bf16.msra.mxu0 (!%p1105_p1), %v1453_v4 }
 0x196   : > { %v611_v26 = vadd.f32 %v1183_v18, %v1148_v13  ;;  %v1456_v13 = vpack.c.bf16 (!%p1105_p1), %v791_v9, %v790_v8  ;;  %1455 = vmatprep.subr.bf16.mxu0 (!%p1105_p1), %v1780_v42  ;;  %v935_v42 = vshrl.u32 (!%p1105_p1), %v797_v0, 7 }
 0x198   : > { %v614_v27 = vadd.f32 %v611_v26, %v473_v22  ;;  %vm938_vm2 = vcmp.lt.s32.totalorder (!%p1105_p1), %v935_v42, 2 }
 0x199   : > { %1457 = vmatpush3.bf16.msra.mxu0 (!%p1105_p1), %v1456_v13 }
 0x19a   : > { %615 = vst [vmem:[#allocation2] sm:$0xff] %v614_v27 }
 0x1a1   : > { %v792_v24 = vld [vmem:[#allocation2] sm:$0xff] (!%p1105_p1) }
 0x1a2   : > { %v2249_v30 = vadd.f32 (!%p1105_p1), %v1106_v23, %v792_v24 }
 0x1b1   : > { %v1216_v31 = vpop.f32.mrb[2].mxu0 }
 0x1b2   : > { %v1251_v35 = vpop.f32.mrb[2].mxu1  ;;  %v1217_v39 = vpop.f32.mrb[3].mxu0 }
 0x1b3   : > { %v1218_v40 = vadd.f32 %v1217_v39, %v1216_v31  ;;  %v1252_v44 = vpop.f32.mrb[3].mxu1 }
 0x1b4   : > { %v1253_v51 = vadd.f32 %v1252_v44, %v1251_v35  ;;  %773 = sbr.rel (%p1105_p1) target bundleno = 1610 (0x64a), region = 68 }
 0x1b6   : > { %v754_v53 = vadd.f32 %v1253_v51, %v1218_v40 }
 0x1b8   : > { %v757_v57 = vadd.f32 %v754_v53, %v616_v52 }
 0x1ba   : > { %758 = vst [vmem:[#allocation3] sm:$0xff] %v757_v57 }
 0x1c1   : > { %v793_v28 = vld [vmem:[#allocation3] sm:$0xff] }
 0x1c2   : > { %v810_v32 = vmul.f32 %v809_v29, %v793_v28 }
 0x1c4   : > { %v811_v33 = vadd.f32 %v810_v32, %v2249_v30 }
 0x1c6   : > { %v814_v34 = vsel %vm799_vm0, %v811_v33, -1e+30 }
 0x1c7   : > { %815 = vmax.xlane.f32.xlu0 %v814_v34 }
 0x1cb   : > { %830 = vadd.xlane.f32.xlu0 %v1550_v36 }
 0x254   : > { %v816_v56 = vpop.xlane.xlu0 %815 }
 0x255   : > { %v817_v58 = vsub.f32 %v814_v34, %v816_v56 }
 0x257   : > { %v818_v59 = vmul.f32 1.442695, %v817_v58 }
 0x258   : > { %v831_v17 = vpop.xlane.xlu0 %830 }
 0x259   : > { %1551 = vpow2.f32 %v818_v59 }
 0x25a   : > { %1553 = vrcp.f32 %v831_v17 }
 0x263   : > { %v1552_v60 = vpop.eup %1551 }
 0x264   : > { %820 = vadd.xlane.f32.xlu1 %v1552_v60  ;;  %v1554_v22 = vpop.eup %1553 }
 0x265   : > { %v833_v31 = vmul.f32 %v1554_v22, %v1550_v36 }
 0x2f1   : > { %v821_v18 = vpop.xlane.xlu1 %820 }
 0x2f2   : > { %1555 = vrcp.f32 %v821_v18 }
 0x2fc   : > { %v1556_v26 = vpop.eup %1555 }
 0x2fd   : > { %v823_v27 = vmul.f32 %v1556_v26, %v1552_v60 }
 0x2ff   : > { %v838_v35 = vsub.f32 %v823_v27, %v833_v31 }
 0x301   : > { %v839_v39 = vmul.f32 0.5, %v838_v35 }
 0x303   : > { %1304 = vmatmul.mubr.f32.vlgmr.msra.gmra.mrb[0].mxu0 %v839_v39 }
 0x3d6   : > { %v906_v40 = vpop.f32.mrb[0].mxu0 }
 0x3d7   : > { %v1305_v44 = vpop.f32.mrb[1].mxu0  ;;  %v910_v51 = vmul.f32 %v906_v40, %v839_v39 }
 0x3d9   : > { %911 = vadd.xlane.f32.xlu1 %v910_v51 }
 0x466   : > { %v912_v52 = vpop.xlane.xlu1 %911 }
 0x467   : > { %v913_v53 = vmax.f32 %v912_v52, 1e-12 }
 0x469   : > { %1557 = vrsqrt.f32 %v913_v53 }
 0x473   : > { %v1558_v57 = vpop.eup %1557 }
 0x474   : > { %v915_v63 = vmul.f32 %v1558_v57, %v906_v40 }
 0x476   : > { %v916_v1 = vadd.f32 %v915_v63, %v2249_v30 }
 0x478   : > { %v917_v15 = vsel %vm799_vm0, %v916_v1, -1e+30 }
 0x479   : > { %918 = vmax.xlane.f32.xlu0 %v917_v15 }
 0x506   : > { %v919_v16 = vpop.xlane.xlu0 %918 }
 0x507   : > { %v920_v20 = vsub.f32 %v917_v15, %v919_v16 }
 0x509   : > { %v921_v21 = vmul.f32 1.442695, %v920_v20 }
 0x50b   : > { %1559 = vpow2.f32 %v921_v21 }
 0x50c   : > { %1561 = vlog2.f32 %v831_v17 }
 0x515   : > { %v1560_v23 = vpop.eup %1559 }
 0x516   : > { %923 = vadd.xlane.f32.xlu1 %v1560_v23  ;;  %v1562_v25 = vpop.eup %1561 }
 0x517   : > { %v835_v28 = vmul.f32 0.6931472, %v1562_v25 }
 0x519   : > { %v836_v32 = vadd.f32 %v835_v28, %v2242_v19 }
 0x51b   : > { %v837_v34 = vsub.f32 %v2239_v14, %v836_v32 }
 0x5a3   : > { %v924_v24 = vpop.xlane.xlu1 %923 }
 0x5a4   : > { %1563 = vlog2.f32 %v924_v24 }
 0x5ae   : > { %v1564_v29 = vpop.eup %1563 }
 0x5af   : > { %v926_v33 = vmul.f32 0.6931472, %v1564_v29 }
 0x5b1   : > { %v927_v30 = vadd.f32 %v926_v33, %v919_v16 }
 0x5b3   : > { %v928_v36 = vsub.f32 %v917_v15, %v927_v30 }
 0x5b5   : > { %v929_v37 = vsub.f32 %v837_v34, %v928_v36 }
 0x5b7   : > { %v930_v38 = vmul.f32 %v929_v37, %v833_v31 }
 0x5b9   : > { %v931_v41 = vsel %vm799_vm0, %v930_v38, 0.0 }
 0x5ba   : > { %932 = vadd.xlane.f32.xlu0 %v931_v41 }
 0x647   : > { %v933_v43 = vpop.xlane.xlu0 %932 }
 0x648   : > { %v939_v45 = vsel %vm938_vm2, %v933_v43, 0.0 }
 0x649   : > { %940 = vst [vmem:[#allocation13] sm:$0xff] %v939_v45 }
 0x64a PF: > { %p1489_p4 = scmp.eq.s32.totalorder %s1911_s19, 1  ;;  %s1783_s30 = smov [#allocation13]  }
 0x64b   : > { %s950_s13 = sshll.u32 %s1783_s30, 4  ;;  %s951_s13 = int_to_ptr.vmem [resolvable:$true] %s950_s13 }
 0x64c   : > { %s1683_s10 = scalar_lea.vmem %s951_s13, 128  ;;  %p1690_p2 = scmp.lt.s32.totalorder %s951_s13, %s951_s13 }
 0x64d   : > { %p1684_p6 = scmp.ne.s32.totalorder %s951_s13, %s1683_s10  ;;  %p1691_p9 = scmp.lt.s32.totalorder %s1683_s10, %s1683_s10 }
 0x64f   : > { %p1685_p13 = pnand %p1684_p6, %p1489_p4  ;;  %p1692_p12 = por %p1691_p9, %p1690_p2 }
 0x651   : > { %p1686_p3 = pneg %p1685_p13 }
 0x653   : > { %p1693_p5 = pnand %p1692_p12, %p1686_p3 }
 0x655   : > { %1696 = shalt.err (!%p1693_p5)
}
 0x656   : > { %s1697_s8 = scalar_lea.hbm %s2309_s6, 128 }
 0x657   : > { %p1698_p8 = scmp.ne.s32.totalorder %s2309_s6, %s1697_s8  ;;  %p1703_p10 = scmp.lt.u32.totalorder %s1697_s8, %s2309_s6 }
 0x659   : > { %p1699_p11 = pnand %p1698_p8, %p1489_p4 }
 0x65b   : > { %p1700_p7 = pneg %p1699_p11 }
 0x65d   : > { %p1705_p0 = pnand %p1703_p10, %p1700_p7 }
 0x65f   : > { %1708 = shalt.err (!%p1705_p0)
}
 0x660   : > { %1469 = dma.vmem_to_hbm [thread:$0]  (%p1489_p4), %s951_s13, 128, %s2309_s6, [#allocation7]  }
 0x661   : > { %1746 = dma.done.wait (%p1489_p4), [#allocation7], 128  }
 0x662   : > { %1748 = vsyncadd (%p1489_p4), [#allocation7], 4294967168 }
 0x663 PF: > { %s2338_s7 = sld [smem:[#allocation19_spill]]  ;;  %s2339_s17 = sld [smem:[#allocation18_spill]] }
 0x664   : > { %s2340_s23 = sld [smem:[#allocation21_spill]]  ;;  %s2341_s18 = sld [smem:[#allocation20_spill]] }
 0x665   : > { %s2342_s21 = smov %s1755_s22  ;;  %s2344_s24 = smov %s1767_s25 }
 0x669   : > { %s24_s26 = sadd.s32 1, %s2338_s7   ;;  %s2343_s22 = smov %s2339_s17 }
 0x66a   : > { %p21_p1 = scmp.ge.s32.totalorder %s24_s26, 4   ;;  %s2345_s25 = smov %s2341_s18 }
 0x66c   :  { %23 = sbr.rel (!%p21_p1) target bundleno = 10 (0xa), region = 121 }
 0x673   :  { %963 = vsyncpa [#allocation6], 1 }
 0x674   :  { %965 = vsyncpa [#allocation6 + $0x1], 1 }
 0x675   :  { %966 = vsyncpa [#allocation9], 1 }
 0x676   :  { %968 = vsyncpa [#allocation9 + $0x1], 1 }
 0x677   :  { %969 = vsyncpa [#allocation12], 1 }
 0x678   :  { %970 = vsyncpa [#allocation7], 1 }
 0x679   :  { %972 = vsyncpa [#allocation7 + $0x1], 1 }

</bundles_post_ra>
